<compile_context>
chip_gen: v7x
topology: tpu7x:2x2x1
jax: 0.10.0
libtpu: 0.0.40
codegen_flags: <defaults>
</compile_context>

<pallas_src>
import functools

import jax
import jax.numpy as jnp
from jax.experimental import pallas as pl
from jax.experimental.pallas import tpu as pltpu

EPS = 1e-5
NEG_SLOPE = 0.2


def _shifted_tap(x, pos, wcol, dy, dx, H, W):
    """Returns x[c, h+dy, w+dx] in flattened (C, H*W) layout, 0 outside image."""
    HW = H * W
    s = dy * W + dx
    t = x if s == 0 else pltpu.roll(x, (-s) % HW, axis=1)
    conds = []
    if dy < 0:
        conds.append(pos >= W)                 # h - 1 >= 0
    elif dy > 0:
        conds.append(pos < (H - 1) * W)        # h + 1 <= H - 1
    if dx < 0:
        conds.append(wcol >= 1)                # w - 1 >= 0
    elif dx > 0:
        conds.append(wcol < W - 1)             # w + 1 <= W - 1
    if conds:
        m = conds[0]
        for c in conds[1:]:
            m = jnp.logical_and(m, c)
        t = jnp.where(m, t, 0.0)
    return t


def _conv_in_lrelu(x, w_ref, b_ref, wcol, H, W):
    """Fused 3x3 stride-1 pad-1 conv + InstanceNorm (no affine) + LeakyReLU(0.2).

    x:     (Cin, H*W) f32 value, spatial flattened on the lane axis
    w_ref: (Cout, 9*Cin) ref, column order = (ky*3 + kx)*Cin + ci
    b_ref: (Cout, 1) ref
    wcol:  (1, H*W) int32 value, w-coordinate of each flattened position
    """
    Cin, HW = x.shape
    pos = jax.lax.broadcasted_iota(jnp.int32, (Cin, HW), 1)

    # nine shifted copies of the input (roll + border mask), stacked along
    # sublanes so the whole conv is one K = 9*Cin contraction.
    taps = []
    for ky in range(3):
        for kx in range(3):
            taps.append(_shifted_tap(x, pos, wcol, ky - 1, kx - 1, H, W))
    im2col = jnp.concatenate(taps, axis=0)                       # (9*Cin, HW)

    # Single fused matmul, N = H*W lane-dense.
    # (For large channel counts on v6e/v7x, casting operands to bf16 with an
    #  f32 accumulator gives ~3x MXU throughput; kept f32 here for the tiny C.)
    y = jnp.dot(w_ref[...], im2col, preferred_element_type=jnp.float32)
    y = y + b_ref[...]                                           # (Cout, HW)

    # InstanceNorm2d: per-channel over H*W, biased variance, no affine.
    # Fused stats: one pass, var = E[y^2] - mean^2.
    inv_hw = 1.0 / HW
    mean = jnp.sum(y, axis=1, keepdims=True) * inv_hw
    ex2 = jnp.sum(y * y, axis=1, keepdims=True) * inv_hw
    var = ex2 - mean * mean
    yn = (y - mean) * jax.lax.rsqrt(var + EPS)

    # LeakyReLU(0.2)
    return jnp.where(yn >= 0, yn, NEG_SLOPE * yn)


def resblock_kernel(x_ref, wcol_ref, w1_ref, b1_ref, w2_ref, b2_ref, o_ref,
                    *, H, W):
    x = x_ref[0]                   # (C, H*W)
    wcol = wcol_ref[...]           # (1, H*W)
    y = _conv_in_lrelu(x, w1_ref, b1_ref, wcol, H, W)
    z = _conv_in_lrelu(y, w2_ref, b2_ref, wcol, H, W)
    o_ref[0] = x + z               # residual add (Cin == Cout)


def resblock_forward(x_nchw, w1, b1, w2, b2):
    """x_nchw: (B, C, H, W) float32; conv weights in PyTorch OIHW layout."""
    B, Cin, H, W = x_nchw.shape
    Cout = w1.shape[0]
    assert Cin == Cout, "resblock residual add requires input_dim == output_dim"
    HW = H * W

    # NCHW stays NCHW — just flatten spatial onto the lane axis (free reshape).
    x_flat = x_nchw.reshape(B, Cin, HW).astype(jnp.float32)

    # OIHW -> (Cout, 9*Cin), column index = (ky*3 + kx)*Cin + ci.
    w1_mat = jnp.transpose(w1, (0, 2, 3, 1)).reshape(Cout, 9 * Cin).astype(jnp.float32)
    w2_mat = jnp.transpose(w2, (0, 2, 3, 1)).reshape(Cout, 9 * Cout).astype(jnp.float32)
    b1_col = b1.reshape(Cout, 1).astype(jnp.float32)
    b2_col = b2.reshape(Cout, 1).astype(jnp.float32)

    # Per-position column coordinate (precomputed so the kernel needs no
    # integer mod on vregs).
    wcol = (jnp.arange(HW, dtype=jnp.int32) % W).reshape(1, HW)

    kernel = functools.partial(resblock_kernel, H=H, W=W)

    out_flat = pl.pallas_call(
        kernel,
        out_shape=jax.ShapeDtypeStruct((B, Cout, HW), jnp.float32),
        grid_spec=pltpu.PrefetchScalarGridSpec(
            num_scalar_prefetch=0,
            grid=(B,),
            in_specs=[
                pl.BlockSpec((1, Cin, HW), lambda b: (b, 0, 0)),
                pl.BlockSpec((1, HW), lambda b: (0, 0)),
                pl.BlockSpec((Cout, 9 * Cin), lambda b: (0, 0)),
                pl.BlockSpec((Cout, 1), lambda b: (0, 0)),
                pl.BlockSpec((Cout, 9 * Cout), lambda b: (0, 0)),
                pl.BlockSpec((Cout, 1), lambda b: (0, 0)),
            ],
            out_specs=pl.BlockSpec((1, Cout, HW), lambda b: (b, 0, 0)),
        ),
        compiler_params=pltpu.CompilerParams(
            dimension_semantics=("parallel",),
            vmem_limit_bytes=32 * 1024 * 1024,
        ),
    )(x_flat, wcol, w1_mat, b1_col, w2_mat, b2_col)

    return out_flat.reshape(B, Cout, H, W)


# ----------------------------- pure-JAX reference -----------------------------
def _ref_convblock(x, w, bias):
    y = jax.lax.conv_general_dilated(
        x, w, window_strides=(1, 1), padding=((1, 1), (1, 1)),
        dimension_numbers=("NCHW", "OIHW", "NCHW"))
    y = y + bias[None, :, None, None]
    mean = jnp.mean(y, axis=(2, 3), keepdims=True)
    var = jnp.mean((y - mean) ** 2, axis=(2, 3), keepdims=True)
    y = (y - mean) * jax.lax.rsqrt(var + EPS)
    return jnp.where(y >= 0, y, NEG_SLOPE * y)


def ref_resblock(x, w1, b1, w2, b2):
    return x + _ref_convblock(_ref_convblock(x, w1, b1), w2, b2)


if __name__ == "__main__":
    B, C, H, W = 2, 4, 16, 16                 # input_dim == output_dim == 4
    key = jax.random.PRNGKey(0)
    kx, k1, kb1, k2, kb2 = jax.random.split(key, 5)

    x = jax.random.normal(kx, (B, C, H, W), dtype=jnp.float32)
    # deterministic synthetic parameters (Conv2d: weight OIHW + bias)
    w1 = jax.random.normal(k1, (C, C, 3, 3), dtype=jnp.float32) * 0.1
    b1 = jax.random.normal(kb1, (C,), dtype=jnp.float32) * 0.1
    w2 = jax.random.normal(k2, (C, C, 3, 3), dtype=jnp.float32) * 0.1
    b2 = jax.random.normal(kb2, (C,), dtype=jnp.float32) * 0.1

    out = jax.block_until_ready(resblock_forward(x, w1, b1, w2, b2))
    ref = jax.block_until_ready(ref_resblock(x, w1, b1, w2, b2))

    assert out.shape == (B, C, H, W)
    assert jnp.allclose(out, ref, atol=1e-2, rtol=1e-2), (
        f"max abs err {jnp.max(jnp.abs(out - ref))}")

    print("KERNEL_OK")
</pallas_src>

<mosaic_0001>
module attributes {stable_mosaic.version = 11 : i64} {
  func.func @resblock_kernel(%arg0: i32, %arg1: memref<1x4x256xf32, #tpu.memory_space<vmem>>, %arg2: memref<1x256xi32, #tpu.memory_space<vmem>>, %arg3: memref<4x36xf32, #tpu.memory_space<vmem>>, %arg4: memref<4x1xf32, #tpu.memory_space<vmem>>, %arg5: memref<4x36xf32, #tpu.memory_space<vmem>>, %arg6: memref<4x1xf32, #tpu.memory_space<vmem>>, %arg7: memref<1x4x256xf32, #tpu.memory_space<vmem>>) attributes {dimension_semantics = [#tpu.dimension_semantics<parallel>], iteration_bounds = array<i64: 2>, scalar_prefetch = 0 : i64, scratch_operands = 0 : i64, tpu.core_type = #tpu.core_type<tc>, window_params = [{transform_indices = @transform_0, window_bounds = array<i64: 1, 4, 256>}, {pipeline_mode = #tpu.pipeline_mode<synchronous>, transform_indices = @transform_1, window_bounds = array<i64: 1, 256>}, {pipeline_mode = #tpu.pipeline_mode<synchronous>, transform_indices = @transform_2, window_bounds = array<i64: 4, 36>}, {pipeline_mode = #tpu.pipeline_mode<synchronous>, transform_indices = @transform_3, window_bounds = array<i64: 4, 1>}, {pipeline_mode = #tpu.pipeline_mode<synchronous>, transform_indices = @transform_4, window_bounds = array<i64: 4, 36>}, {pipeline_mode = #tpu.pipeline_mode<synchronous>, transform_indices = @transform_5, window_bounds = array<i64: 4, 1>}, {transform_indices = @transform_6, window_bounds = array<i64: 1, 4, 256>}]} {
    %c0 = arith.constant 0 : index
    %c0_0 = arith.constant 0 : index
    %c0_1 = arith.constant 0 : index
    %0 = vector.load %arg1[%c0, %c0_0, %c0_1] : memref<1x4x256xf32, #tpu.memory_space<vmem>>, vector<1x4x256xf32>
    %1 = vector.shape_cast %0 : vector<1x4x256xf32> to vector<4x256xf32>
    %c0_2 = arith.constant 0 : index
    %c0_3 = arith.constant 0 : index
    %2 = vector.load %arg2[%c0_2, %c0_3] : memref<1x256xi32, #tpu.memory_space<vmem>>, vector<1x256xi32>
    %3 = tpu.iota {dimensions = array<i32: 1>} : vector<4x256xi32>
    %c17_i32 = arith.constant 17 : i32
    %4 = tpu.dynamic_rotate %1 by %c17_i32 dim 1 : vector<4x256xf32>, i32 -> vector<4x256xf32>
    %c16_i32 = arith.constant 16 : i32
    %5 = vector.broadcast %c16_i32 : i32 to vector<4x256xi32>
    %6 = arith.cmpi sge, %3, %5 : vector<4x256xi32>
    %c1_i32 = arith.constant 1 : i32
    %7 = vector.broadcast %c1_i32 : i32 to vector<1x256xi32>
    %8 = arith.cmpi sge, %2, %7 : vector<1x256xi32>
    %9 = vector.broadcast %8 : vector<1x256xi1> to vector<4x256xi1>
    %10 = arith.andi %6, %9 : vector<4x256xi1>
    %cst = arith.constant 0.000000e+00 : f32
    %11 = vector.broadcast %cst : f32 to vector<4x256xf32>
    %12 = arith.select %10, %4, %11 : vector<4x256xi1>, vector<4x256xf32>
    %c16_i32_4 = arith.constant 16 : i32
    %13 = tpu.dynamic_rotate %1 by %c16_i32_4 dim 1 : vector<4x256xf32>, i32 -> vector<4x256xf32>
    %c16_i32_5 = arith.constant 16 : i32
    %14 = vector.broadcast %c16_i32_5 : i32 to vector<4x256xi32>
    %15 = arith.cmpi sge, %3, %14 : vector<4x256xi32>
    %cst_6 = arith.constant 0.000000e+00 : f32
    %16 = vector.broadcast %cst_6 : f32 to vector<4x256xf32>
    %17 = arith.select %15, %13, %16 : vector<4x256xi1>, vector<4x256xf32>
    %c15_i32 = arith.constant 15 : i32
    %18 = tpu.dynamic_rotate %1 by %c15_i32 dim 1 : vector<4x256xf32>, i32 -> vector<4x256xf32>
    %c16_i32_7 = arith.constant 16 : i32
    %19 = vector.broadcast %c16_i32_7 : i32 to vector<4x256xi32>
    %20 = arith.cmpi sge, %3, %19 : vector<4x256xi32>
    %c15_i32_8 = arith.constant 15 : i32
    %21 = vector.broadcast %c15_i32_8 : i32 to vector<1x256xi32>
    %22 = arith.cmpi slt, %2, %21 : vector<1x256xi32>
    %23 = vector.broadcast %22 : vector<1x256xi1> to vector<4x256xi1>
    %24 = arith.andi %20, %23 : vector<4x256xi1>
    %cst_9 = arith.constant 0.000000e+00 : f32
    %25 = vector.broadcast %cst_9 : f32 to vector<4x256xf32>
    %26 = arith.select %24, %18, %25 : vector<4x256xi1>, vector<4x256xf32>
    %c1_i32_10 = arith.constant 1 : i32
    %27 = tpu.dynamic_rotate %1 by %c1_i32_10 dim 1 : vector<4x256xf32>, i32 -> vector<4x256xf32>
    %c1_i32_11 = arith.constant 1 : i32
    %28 = vector.broadcast %c1_i32_11 : i32 to vector<1x256xi32>
    %29 = arith.cmpi sge, %2, %28 : vector<1x256xi32>
    %cst_12 = arith.constant 0.000000e+00 : f32
    %30 = vector.shape_cast %29 : vector<1x256xi1> to vector<1x256xi1>
    %31 = vector.broadcast %30 : vector<1x256xi1> to vector<4x256xi1>
    %32 = vector.broadcast %cst_12 : f32 to vector<4x256xf32>
    %33 = arith.select %31, %27, %32 : vector<4x256xi1>, vector<4x256xf32>
    %c255_i32 = arith.constant 255 : i32
    %34 = tpu.dynamic_rotate %1 by %c255_i32 dim 1 : vector<4x256xf32>, i32 -> vector<4x256xf32>
    %c15_i32_13 = arith.constant 15 : i32
    %35 = vector.broadcast %c15_i32_13 : i32 to vector<1x256xi32>
    %36 = arith.cmpi slt, %2, %35 : vector<1x256xi32>
    %cst_14 = arith.constant 0.000000e+00 : f32
    %37 = vector.shape_cast %36 : vector<1x256xi1> to vector<1x256xi1>
    %38 = vector.broadcast %37 : vector<1x256xi1> to vector<4x256xi1>
    %39 = vector.broadcast %cst_14 : f32 to vector<4x256xf32>
    %40 = arith.select %38, %34, %39 : vector<4x256xi1>, vector<4x256xf32>
    %c241_i32 = arith.constant 241 : i32
    %41 = tpu.dynamic_rotate %1 by %c241_i32 dim 1 : vector<4x256xf32>, i32 -> vector<4x256xf32>
    %c240_i32 = arith.constant 240 : i32
    %42 = vector.broadcast %c240_i32 : i32 to vector<4x256xi32>
    %43 = arith.cmpi slt, %3, %42 : vector<4x256xi32>
    %c1_i32_15 = arith.constant 1 : i32
    %44 = vector.broadcast %c1_i32_15 : i32 to vector<1x256xi32>
    %45 = arith.cmpi sge, %2, %44 : vector<1x256xi32>
    %46 = vector.broadcast %45 : vector<1x256xi1> to vector<4x256xi1>
    %47 = arith.andi %43, %46 : vector<4x256xi1>
    %cst_16 = arith.constant 0.000000e+00 : f32
    %48 = vector.broadcast %cst_16 : f32 to vector<4x256xf32>
    %49 = arith.select %47, %41, %48 : vector<4x256xi1>, vector<4x256xf32>
    %c240_i32_17 = arith.constant 240 : i32
    %50 = tpu.dynamic_rotate %1 by %c240_i32_17 dim 1 : vector<4x256xf32>, i32 -> vector<4x256xf32>
    %c240_i32_18 = arith.constant 240 : i32
    %51 = vector.broadcast %c240_i32_18 : i32 to vector<4x256xi32>
    %52 = arith.cmpi slt, %3, %51 : vector<4x256xi32>
    %cst_19 = arith.constant 0.000000e+00 : f32
    %53 = vector.broadcast %cst_19 : f32 to vector<4x256xf32>
    %54 = arith.select %52, %50, %53 : vector<4x256xi1>, vector<4x256xf32>
    %c239_i32 = arith.constant 239 : i32
    %55 = tpu.dynamic_rotate %1 by %c239_i32 dim 1 : vector<4x256xf32>, i32 -> vector<4x256xf32>
    %c240_i32_20 = arith.constant 240 : i32
    %56 = vector.broadcast %c240_i32_20 : i32 to vector<4x256xi32>
    %57 = arith.cmpi slt, %3, %56 : vector<4x256xi32>
    %c15_i32_21 = arith.constant 15 : i32
    %58 = vector.broadcast %c15_i32_21 : i32 to vector<1x256xi32>
    %59 = arith.cmpi slt, %2, %58 : vector<1x256xi32>
    %60 = vector.broadcast %59 : vector<1x256xi1> to vector<4x256xi1>
    %61 = arith.andi %57, %60 : vector<4x256xi1>
    %cst_22 = arith.constant 0.000000e+00 : f32
    %62 = vector.broadcast %cst_22 : f32 to vector<4x256xf32>
    %63 = arith.select %61, %55, %62 : vector<4x256xi1>, vector<4x256xf32>
    %64 = tpu.concatenate %12, %17, %26, %33, %1, %40, %49, %54, %63 in 0 : vector<4x256xf32>, vector<4x256xf32>, vector<4x256xf32>, vector<4x256xf32>, vector<4x256xf32>, vector<4x256xf32>, vector<4x256xf32>, vector<4x256xf32>, vector<4x256xf32> -> vector<36x256xf32>
    %c0_23 = arith.constant 0 : index
    %c0_24 = arith.constant 0 : index
    %65 = vector.load %arg3[%c0_23, %c0_24] : memref<4x36xf32, #tpu.memory_space<vmem>>, vector<4x36xf32>
    %cst_25 = arith.constant dense<0.000000e+00> : vector<4x256xf32>
    %66 = tpu.matmul %65, %64, %cst_25 {dimension_numbers = #tpu.dot_dimension_numbers<[1], [0], [0], [1], [0, 0, 1, 1], [], []>} : vector<4x36xf32>, vector<36x256xf32>, vector<4x256xf32> -> vector<4x256xf32>
    %c0_26 = arith.constant 0 : index
    %c0_27 = arith.constant 0 : index
    %67 = vector.load %arg4[%c0_26, %c0_27] : memref<4x1xf32, #tpu.memory_space<vmem>>, vector<4x1xf32>
    %68 = vector.broadcast %67 : vector<4x1xf32> to vector<4x256xf32>
    %69 = arith.addf %66, %68 : vector<4x256xf32>
    %cst_28 = arith.constant dense<0.000000e+00> : vector<4xf32>
    %70 = vector.multi_reduction <add>, %69, %cst_28 [1] : vector<4x256xf32> to vector<4xf32>
    %71 = vector.shape_cast %70 : vector<4xf32> to vector<4x1xf32>
    %cst_29 = arith.constant 3.906250e-03 : f32
    %72 = vector.broadcast %cst_29 : f32 to vector<4x1xf32>
    %73 = arith.mulf %71, %72 : vector<4x1xf32>
    %74 = arith.mulf %69, %69 : vector<4x256xf32>
    %cst_30 = arith.constant dense<0.000000e+00> : vector<4xf32>
    %75 = vector.multi_reduction <add>, %74, %cst_30 [1] : vector<4x256xf32> to vector<4xf32>
    %76 = vector.shape_cast %75 : vector<4xf32> to vector<4x1xf32>
    %cst_31 = arith.constant 3.906250e-03 : f32
    %77 = vector.broadcast %cst_31 : f32 to vector<4x1xf32>
    %78 = arith.mulf %76, %77 : vector<4x1xf32>
    %79 = arith.mulf %73, %73 : vector<4x1xf32>
    %80 = arith.subf %78, %79 : vector<4x1xf32>
    %81 = vector.broadcast %73 : vector<4x1xf32> to vector<4x256xf32>
    %82 = arith.subf %69, %81 : vector<4x256xf32>
    %cst_32 = arith.constant 9.99999974E-6 : f32
    %83 = vector.broadcast %cst_32 : f32 to vector<4x1xf32>
    %84 = arith.addf %80, %83 : vector<4x1xf32>
    %85 = math.rsqrt %84 : vector<4x1xf32>
    %86 = vector.broadcast %85 : vector<4x1xf32> to vector<4x256xf32>
    %87 = arith.mulf %82, %86 : vector<4x256xf32>
    %cst_33 = arith.constant 0.000000e+00 : f32
    %88 = vector.broadcast %cst_33 : f32 to vector<4x256xf32>
    %89 = arith.cmpf oge, %87, %88 : vector<4x256xf32>
    %cst_34 = arith.constant 2.000000e-01 : f32
    %90 = vector.broadcast %cst_34 : f32 to vector<4x256xf32>
    %91 = arith.mulf %90, %87 : vector<4x256xf32>
    %92 = arith.select %89, %87, %91 : vector<4x256xi1>, vector<4x256xf32>
    %93 = tpu.iota {dimensions = array<i32: 1>} : vector<4x256xi32>
    %c17_i32_35 = arith.constant 17 : i32
    %94 = tpu.dynamic_rotate %92 by %c17_i32_35 dim 1 : vector<4x256xf32>, i32 -> vector<4x256xf32>
    %c16_i32_36 = arith.constant 16 : i32
    %95 = vector.broadcast %c16_i32_36 : i32 to vector<4x256xi32>
    %96 = arith.cmpi sge, %93, %95 : vector<4x256xi32>
    %c1_i32_37 = arith.constant 1 : i32
    %97 = vector.broadcast %c1_i32_37 : i32 to vector<1x256xi32>
    %98 = arith.cmpi sge, %2, %97 : vector<1x256xi32>
    %99 = vector.broadcast %98 : vector<1x256xi1> to vector<4x256xi1>
    %100 = arith.andi %96, %99 : vector<4x256xi1>
    %cst_38 = arith.constant 0.000000e+00 : f32
    %101 = vector.broadcast %cst_38 : f32 to vector<4x256xf32>
    %102 = arith.select %100, %94, %101 : vector<4x256xi1>, vector<4x256xf32>
    %c16_i32_39 = arith.constant 16 : i32
    %103 = tpu.dynamic_rotate %92 by %c16_i32_39 dim 1 : vector<4x256xf32>, i32 -> vector<4x256xf32>
    %c16_i32_40 = arith.constant 16 : i32
    %104 = vector.broadcast %c16_i32_40 : i32 to vector<4x256xi32>
    %105 = arith.cmpi sge, %93, %104 : vector<4x256xi32>
    %cst_41 = arith.constant 0.000000e+00 : f32
    %106 = vector.broadcast %cst_41 : f32 to vector<4x256xf32>
    %107 = arith.select %105, %103, %106 : vector<4x256xi1>, vector<4x256xf32>
    %c15_i32_42 = arith.constant 15 : i32
    %108 = tpu.dynamic_rotate %92 by %c15_i32_42 dim 1 : vector<4x256xf32>, i32 -> vector<4x256xf32>
    %c16_i32_43 = arith.constant 16 : i32
    %109 = vector.broadcast %c16_i32_43 : i32 to vector<4x256xi32>
    %110 = arith.cmpi sge, %93, %109 : vector<4x256xi32>
    %c15_i32_44 = arith.constant 15 : i32
    %111 = vector.broadcast %c15_i32_44 : i32 to vector<1x256xi32>
    %112 = arith.cmpi slt, %2, %111 : vector<1x256xi32>
    %113 = vector.broadcast %112 : vector<1x256xi1> to vector<4x256xi1>
    %114 = arith.andi %110, %113 : vector<4x256xi1>
    %cst_45 = arith.constant 0.000000e+00 : f32
    %115 = vector.broadcast %cst_45 : f32 to vector<4x256xf32>
    %116 = arith.select %114, %108, %115 : vector<4x256xi1>, vector<4x256xf32>
    %c1_i32_46 = arith.constant 1 : i32
    %117 = tpu.dynamic_rotate %92 by %c1_i32_46 dim 1 : vector<4x256xf32>, i32 -> vector<4x256xf32>
    %c1_i32_47 = arith.constant 1 : i32
    %118 = vector.broadcast %c1_i32_47 : i32 to vector<1x256xi32>
    %119 = arith.cmpi sge, %2, %118 : vector<1x256xi32>
    %cst_48 = arith.constant 0.000000e+00 : f32
    %120 = vector.shape_cast %119 : vector<1x256xi1> to vector<1x256xi1>
    %121 = vector.broadcast %120 : vector<1x256xi1> to vector<4x256xi1>
    %122 = vector.broadcast %cst_48 : f32 to vector<4x256xf32>
    %123 = arith.select %121, %117, %122 : vector<4x256xi1>, vector<4x256xf32>
    %c255_i32_49 = arith.constant 255 : i32
    %124 = tpu.dynamic_rotate %92 by %c255_i32_49 dim 1 : vector<4x256xf32>, i32 -> vector<4x256xf32>
    %c15_i32_50 = arith.constant 15 : i32
    %125 = vector.broadcast %c15_i32_50 : i32 to vector<1x256xi32>
    %126 = arith.cmpi slt, %2, %125 : vector<1x256xi32>
    %cst_51 = arith.constant 0.000000e+00 : f32
    %127 = vector.shape_cast %126 : vector<1x256xi1> to vector<1x256xi1>
    %128 = vector.broadcast %127 : vector<1x256xi1> to vector<4x256xi1>
    %129 = vector.broadcast %cst_51 : f32 to vector<4x256xf32>
    %130 = arith.select %128, %124, %129 : vector<4x256xi1>, vector<4x256xf32>
    %c241_i32_52 = arith.constant 241 : i32
    %131 = tpu.dynamic_rotate %92 by %c241_i32_52 dim 1 : vector<4x256xf32>, i32 -> vector<4x256xf32>
    %c240_i32_53 = arith.constant 240 : i32
    %132 = vector.broadcast %c240_i32_53 : i32 to vector<4x256xi32>
    %133 = arith.cmpi slt, %93, %132 : vector<4x256xi32>
    %c1_i32_54 = arith.constant 1 : i32
    %134 = vector.broadcast %c1_i32_54 : i32 to vector<1x256xi32>
    %135 = arith.cmpi sge, %2, %134 : vector<1x256xi32>
    %136 = vector.broadcast %135 : vector<1x256xi1> to vector<4x256xi1>
    %137 = arith.andi %133, %136 : vector<4x256xi1>
    %cst_55 = arith.constant 0.000000e+00 : f32
    %138 = vector.broadcast %cst_55 : f32 to vector<4x256xf32>
    %139 = arith.select %137, %131, %138 : vector<4x256xi1>, vector<4x256xf32>
    %c240_i32_56 = arith.constant 240 : i32
    %140 = tpu.dynamic_rotate %92 by %c240_i32_56 dim 1 : vector<4x256xf32>, i32 -> vector<4x256xf32>
    %c240_i32_57 = arith.constant 240 : i32
    %141 = vector.broadcast %c240_i32_57 : i32 to vector<4x256xi32>
    %142 = arith.cmpi slt, %93, %141 : vector<4x256xi32>
    %cst_58 = arith.constant 0.000000e+00 : f32
    %143 = vector.broadcast %cst_58 : f32 to vector<4x256xf32>
    %144 = arith.select %142, %140, %143 : vector<4x256xi1>, vector<4x256xf32>
    %c239_i32_59 = arith.constant 239 : i32
    %145 = tpu.dynamic_rotate %92 by %c239_i32_59 dim 1 : vector<4x256xf32>, i32 -> vector<4x256xf32>
    %c240_i32_60 = arith.constant 240 : i32
    %146 = vector.broadcast %c240_i32_60 : i32 to vector<4x256xi32>
    %147 = arith.cmpi slt, %93, %146 : vector<4x256xi32>
    %c15_i32_61 = arith.constant 15 : i32
    %148 = vector.broadcast %c15_i32_61 : i32 to vector<1x256xi32>
    %149 = arith.cmpi slt, %2, %148 : vector<1x256xi32>
    %150 = vector.broadcast %149 : vector<1x256xi1> to vector<4x256xi1>
    %151 = arith.andi %147, %150 : vector<4x256xi1>
    %cst_62 = arith.constant 0.000000e+00 : f32
    %152 = vector.broadcast %cst_62 : f32 to vector<4x256xf32>
    %153 = arith.select %151, %145, %152 : vector<4x256xi1>, vector<4x256xf32>
    %154 = tpu.concatenate %102, %107, %116, %123, %92, %130, %139, %144, %153 in 0 : vector<4x256xf32>, vector<4x256xf32>, vector<4x256xf32>, vector<4x256xf32>, vector<4x256xf32>, vector<4x256xf32>, vector<4x256xf32>, vector<4x256xf32>, vector<4x256xf32> -> vector<36x256xf32>
    %c0_63 = arith.constant 0 : index
    %c0_64 = arith.constant 0 : index
    %155 = vector.load %arg5[%c0_63, %c0_64] : memref<4x36xf32, #tpu.memory_space<vmem>>, vector<4x36xf32>
    %cst_65 = arith.constant dense<0.000000e+00> : vector<4x256xf32>
    %156 = tpu.matmul %155, %154, %cst_65 {dimension_numbers = #tpu.dot_dimension_numbers<[1], [0], [0], [1], [0, 0, 1, 1], [], []>} : vector<4x36xf32>, vector<36x256xf32>, vector<4x256xf32> -> vector<4x256xf32>
    %c0_66 = arith.constant 0 : index
    %c0_67 = arith.constant 0 : index
    %157 = vector.load %arg6[%c0_66, %c0_67] : memref<4x1xf32, #tpu.memory_space<vmem>>, vector<4x1xf32>
    %158 = vector.broadcast %157 : vector<4x1xf32> to vector<4x256xf32>
    %159 = arith.addf %156, %158 : vector<4x256xf32>
    %cst_68 = arith.constant dense<0.000000e+00> : vector<4xf32>
    %160 = vector.multi_reduction <add>, %159, %cst_68 [1] : vector<4x256xf32> to vector<4xf32>
    %161 = vector.shape_cast %160 : vector<4xf32> to vector<4x1xf32>
    %cst_69 = arith.constant 3.906250e-03 : f32
    %162 = vector.broadcast %cst_69 : f32 to vector<4x1xf32>
    %163 = arith.mulf %161, %162 : vector<4x1xf32>
    %164 = arith.mulf %159, %159 : vector<4x256xf32>
    %cst_70 = arith.constant dense<0.000000e+00> : vector<4xf32>
    %165 = vector.multi_reduction <add>, %164, %cst_70 [1] : vector<4x256xf32> to vector<4xf32>
    %166 = vector.shape_cast %165 : vector<4xf32> to vector<4x1xf32>
    %cst_71 = arith.constant 3.906250e-03 : f32
    %167 = vector.broadcast %cst_71 : f32 to vector<4x1xf32>
    %168 = arith.mulf %166, %167 : vector<4x1xf32>
    %169 = arith.mulf %163, %163 : vector<4x1xf32>
    %170 = arith.subf %168, %169 : vector<4x1xf32>
    %171 = vector.broadcast %163 : vector<4x1xf32> to vector<4x256xf32>
    %172 = arith.subf %159, %171 : vector<4x256xf32>
    %cst_72 = arith.constant 9.99999974E-6 : f32
    %173 = vector.broadcast %cst_72 : f32 to vector<4x1xf32>
    %174 = arith.addf %170, %173 : vector<4x1xf32>
    %175 = math.rsqrt %174 : vector<4x1xf32>
    %176 = vector.broadcast %175 : vector<4x1xf32> to vector<4x256xf32>
    %177 = arith.mulf %172, %176 : vector<4x256xf32>
    %cst_73 = arith.constant 0.000000e+00 : f32
    %178 = vector.broadcast %cst_73 : f32 to vector<4x256xf32>
    %179 = arith.cmpf oge, %177, %178 : vector<4x256xf32>
    %cst_74 = arith.constant 2.000000e-01 : f32
    %180 = vector.broadcast %cst_74 : f32 to vector<4x256xf32>
    %181 = arith.mulf %180, %177 : vector<4x256xf32>
    %182 = arith.select %179, %177, %181 : vector<4x256xi1>, vector<4x256xf32>
    %183 = arith.addf %1, %182 : vector<4x256xf32>
    %c0_75 = arith.constant 0 : index
    %c0_76 = arith.constant 0 : index
    %c0_77 = arith.constant 0 : index
    %184 = vector.load %arg7[%c0_75, %c0_76, %c0_77] : memref<1x4x256xf32, #tpu.memory_space<vmem>>, vector<1x4x256xf32>
    %185 = vector.shape_cast %184 : vector<1x4x256xf32> to vector<4x256xf32>
    %186 = vector.shape_cast %183 : vector<4x256xf32> to vector<1x4x256xf32>
    tpu.vector_store %arg7[%c0_75, %c0_76, %c0_77], %186 {strides = array<i32>} : memref<1x4x256xf32, #tpu.memory_space<vmem>>, vector<1x4x256xf32>,
    return
  }
  func.func @transform_0(%arg0: i32) -> (i32, i32, i32) {
    %c0_i32 = arith.constant 0 : i32
    %c0_i32_0 = arith.constant 0 : i32
    %c0_i32_1 = arith.constant 0 : i32
    return %arg0, %c0_i32, %c0_i32_0 : i32, i32, i32
  }
  func.func @transform_1(%arg0: i32) -> (i32, i32) {
    %c0_i32 = arith.constant 0 : i32
    %c0_i32_0 = arith.constant 0 : i32
    %c0_i32_1 = arith.constant 0 : i32
    return %c0_i32, %c0_i32_0 : i32, i32
  }
  func.func @transform_2(%arg0: i32) -> (i32, i32) {
    %c0_i32 = arith.constant 0 : i32
    %c0_i32_0 = arith.constant 0 : i32
    %c0_i32_1 = arith.constant 0 : i32
    return %c0_i32, %c0_i32_0 : i32, i32
  }
  func.func @transform_3(%arg0: i32) -> (i32, i32) {
    %c0_i32 = arith.constant 0 : i32
    %c0_i32_0 = arith.constant 0 : i32
    %c0_i32_1 = arith.constant 0 : i32
    return %c0_i32, %c0_i32_0 : i32, i32
  }
  func.func @transform_4(%arg0: i32) -> (i32, i32) {
    %c0_i32 = arith.constant 0 : i32
    %c0_i32_0 = arith.constant 0 : i32
    %c0_i32_1 = arith.constant 0 : i32
    return %c0_i32, %c0_i32_0 : i32, i32
  }
  func.func @transform_5(%arg0: i32) -> (i32, i32) {
    %c0_i32 = arith.constant 0 : i32
    %c0_i32_0 = arith.constant 0 : i32
    %c0_i32_1 = arith.constant 0 : i32
    return %c0_i32, %c0_i32_0 : i32, i32
  }
  func.func @transform_6(%arg0: i32) -> (i32, i32, i32) {
    %c0_i32 = arith.constant 0 : i32
    %c0_i32_0 = arith.constant 0 : i32
    %c0_i32_1 = arith.constant 0 : i32
    return %arg0, %c0_i32, %c0_i32_0 : i32, i32, i32
  }
}

</mosaic_0001>

<bundles_post_ra>
// kernel: tpu_custom_call.1
= control target key start
LH: loop header
LB: loop body
LE: loop exit
PB: predicated region body
PF: predicated region fallthrough
CT: control target
= control target key end

     0   :  { %11 = vsyncpa [#allocation3], 0  ;;  %s1581_s0 = inlined_call_operand.hbm [shape: f32[2,4,256], index: 0, kind: input, shape index: {}]   ;;  %s1582_s1 = inlined_call_operand.vmem [shape: s32[1,256], index: 1, kind: input, shape index: {}]   ;;  %s1583_s2 = inlined_call_operand.vmem [shape: f32[4,36], index: 2, kind: input, shape index: {}]   ;;  %s1584_s3 = inlined_call_operand.vmem [shape: f32[4,1], index: 3, kind: input, shape index: {}]   ;;  %s1585_s4 = inlined_call_operand.vmem [shape: f32[4,36], index: 4, kind: input, shape index: {}]   ;;  %s1586_s5 = inlined_call_operand.vmem [shape: f32[4,1], index: 5, kind: input, shape index: {}]   ;;  %s1587_s6 = inlined_call_operand.hbm [shape: f32[2,4,256], index: 6, kind: output, shape index: {}]  }
   0x1   :  { %13 = vsyncpa [#allocation3 + $0x1], 0 }
   0x2   :  { %14 = vsyncpa [#allocation4], 0 }
   0x3   :  { %16 = vsyncpa [#allocation4 + $0x1], 0  ;;  %s1151_s21 = smov 0   ;;  %s1153_s22 = smov 0  }
   0x4   :  { %s1155_s23 = smov 0   ;;  %s1157_s24 = smov 0  }
   0x5 LB: > { %s1172_s25 = sadd.s32 4294967295, %s1102_s24   ;;  %s835_s26 = sadd.s32 4294967294, %s1102_s24   ;;  %s1102_s24 = sphi %s1157_s24, %s1627_s24   ;;  %s1098_s23 = sphi %s1155_s23, %s1626_s23   ;;  %s1094_s22 = sphi %s1153_s22, %s1625_s22   ;;  %s1090_s21 = sphi %s1151_s21, %s1624_s21  }
   0x6   : > { %s1176_s27 = sadd.s32 1, %s1102_s24   ;;  %s29_s28 = sadd.s32 1, %s1098_s23 }
   0x7   : > { %s26_s29 = ssub.s32 %s1102_s24, %s1176_s27  ;;  %p36_p0 = scmp.ne.s32.totalorder %s1098_s23, %s1094_s22 }
   0x8   : > { %p27_p1 = scmp.eq.s32.totalorder %s26_s29, 0  ;;  %p37_p2 = scmp.eq.s32.totalorder %s1102_s24, 0 }
   0x9   : > { %p42_p3 = scmp.ne.s32.totalorder %s1094_s22, %s1090_s21  ;;  %p43_p4 = scmp.eq.s32.totalorder %s1172_s25, 0 }
   0xa   : > { %s1188_s30 = scalar_select %p27_p1, %s1098_s23, %s29_s28  }
   0xb   : > { %p1190_p5 = por %p37_p2, %p36_p0  ;;  %p1194_p6 = por %p43_p4, %p42_p3 }
   0xc   : > { %p171_p7 = scmp.eq.s32.totalorder %s1172_s25, 1  ;;  %p177_p8 = scmp.eq.s32.totalorder %s835_s26, 1 }
   0xd   : > { %p885_p10 = scmp.lt.s32.totalorder %s1102_s24, 2  ;;  %s212_s11 = sand.u32 1, %s1098_s23  }
   0xe   : > { %p1201_p11 = por %p171_p7, %p36_p0  ;;  %p1205_p12 = por %p177_p8, %p42_p3 }
   0xf   : > { %s855_s12 = sshll.u32 %s1102_s24, 7  ;;  %s838_s13 = sshll.u32 %s212_s11, 3 }
  0x10   : > { %s1597_s9 = scalar_select %p1201_p11, 1, 0 }
  0x11   : > { %s1598_s10 = scalar_select %p1205_p12, 1, 0 }
  0x12   : > { %s1214_s16 = scalar_lea.hbm %s1581_s0, %s855_s12  ;;  %s216_s17 = scalar_lea.vmem [#allocation2], %s838_s13 }
  0x13   : > { %s224_s18 = sshll.u32 %s216_s17, 4  ;;  %p1218_p13 = pnand %p885_p10, %p1190_p5  ;;  %s1222_s18 = int_to_ptr.vmem [resolvable:$true] %s224_s18 }
  0x14   : > { %s213_s20 = scalar_lea.sflag [#allocation3], %s212_s11  ;;  %s1006_s26 = scalar_lea.hbm %s1214_s16, 128 }
  0x15   : > { %p1007_p2 = scmp.ne.s32.totalorder %s1214_s16, %s1006_s26  ;;  %p1008_p3 = pneg %p1218_p13 }
  0x16   : > { %s1011_s7 = scalar_lea.hbm %s1581_s0, 256  ;;  %p1012_p5 = scmp.lt.u32.totalorder %s1214_s16, %s1581_s0 }
  0x17   : > { %p1009_p4 = pnand %p1008_p3, %p1007_p2  ;;  %p1013_p8 = scmp.lt.u32.totalorder %s1011_s7, %s1006_s26 }
  0x18   : > { %p1015_p9 = scmp.lt.u32.totalorder %s1006_s26, %s1214_s16 }
  0x19   : > { %p1010_p7 = pneg %p1009_p4  ;;  %p1014_p10 = por %p1013_p8, %p1012_p5 }
  0x1b   : > { %p1016_p0 = por %p1015_p9, %p1014_p10 }
  0x1d   : > { %p1017_p1 = pnand %p1016_p0, %p1010_p7 }
  0x1f   : > { %1020 = shalt.err (!%p1017_p1)
}
  0x20   : > { %s1021_s11 = scalar_lea.vmem %s1222_s18, 128  ;;  %s1104_s14 = smov [#allocation2]  }
  0x21   : > { %p1022_p2 = scmp.ne.s32.totalorder %s1222_s18, %s1021_s11  ;;  %s1026_s15 = sshll.u32 %s1104_s14, 4  ;;  %s1027_s15 = int_to_ptr.vmem [resolvable:$false] %s1026_s15 }
  0x22   : > { %s1028_s17 = scalar_lea.vmem %s1027_s15, 256  ;;  %p1029_p11 = scmp.lt.s32.totalorder %s1222_s18, %s1027_s15 }
  0x23   : > { %p1024_p4 = pnand %p1022_p2, %p1008_p3  ;;  %p1030_p5 = scmp.lt.s32.totalorder %s1028_s17, %s1021_s11 }
  0x25   : > { %p1025_p12 = pneg %p1024_p4  ;;  %p1031_p8 = por %p1030_p5, %p1029_p11 }
  0x27   : > { %p1032_p9 = pnand %p1031_p8, %p1025_p12 }
  0x29   : > { %1035 = shalt.err (!%p1032_p9)
}
  0x2a   : > { %880 = dma.hbm_to_vmem [thread:$0]  (!%p1218_p13), %s1214_s16, 128, %s1222_s18, %s213_s20  }
  0x2b   : > { %p1600_p0 = scmp.lt.s32.totalorder %s1102_s24, 3  ;;  %p1601_p1 = scmp.ge.s32.totalorder %s1102_s24, 1 }
  0x2d   : > { %p230_p3 = pnand %p1601_p1, %p1600_p0 }
  0x2e   : > { %s1256_s26 = sand.u32 (!%p230_p3), 1, %s1094_s22  }
  0x2f   : > { %233 = sbr.rel (%p230_p3) target bundleno = 1131 (0x46b), region = 44  ;;  %s842_s28 = sshll.u32 (!%p230_p3), %s1256_s26, 3 }
  0x30   : > { %s236_s29 = scalar_lea.sflag (!%p230_p3), [#allocation3], %s1256_s26  ;;  %s239_s19 = scalar_lea.vmem (!%p230_p3), [#allocation2], %s842_s28 }
  0x36   : > { %1081 = dma.done.wait (%p1194_p6), %s236_s29, 128  }
  0x37   : > { %1083 = vsyncadd (%p1194_p6), %s236_s29, 4294967168  ;;  %v1105_v0 = vmov 0   ;;  %v1266_v1 = vld [vmem:[%s239_s19] sm:$0xff]  ;;  %s1106_s16 = smov 17   ;;  %s1107_s18 = smov 1   ;;  %v1114_v4 = vmov 0.0   ;;  %v270_v6 = vlaneseq }
  0x38   : > { %964 = vset.pattern.permute.xlu1 %v1105_v0  ;;  %1000 = vset.pattern.permute.xlu0 %v1105_v0  ;;  %v1270_v2 = vcombine.high %v1266_v1, %v1266_v1  ;;  %s1108_s8 = smov 15   ;;  %s1109_s20 = smov 16   ;;  %v418_v5 = vld [vmem:[%s1584_s3] sm:$0xf]  ;;  %vm408_vm11 = vcmask 1043456  }
  0x39   : > { %s1110_s7 = smov 127   ;;  %s1111_s12 = smov 112   ;;  %498 = vmatprep.mubr.f32.mxu0 %v1114_v4  ;;  %709 = vmatprep.mubr.f32.mxu1 %v1114_v4  ;;  %v269_v7 = vld [vmem:[%s1582_s1] sm:$0x3]  ;;  %v288_v8 = vshrl.u32 %v270_v6, 7  ;;  %v1291_v12 = vand.u32 127, %v270_v6 }
  0x3a   : > { %v939_v3 = vpack.i.bf16 %v1270_v2, %v1266_v1  ;;  %s1112_s13 = smov 113   ;;  %s1113_s11 = smov 111   ;;  %vm285_vm0 = vcmp.ge.s32.totalorder %v269_v7, 1  ;;  %vm317_vm1 = vcmp.lt.s32.totalorder %v269_v7, 15 }
  0x3b   : > { %v289_v9 = vsub.s32 0, %v288_v8  ;;  %v293_v10 = vsub.s32 1, %v288_v8  ;;  %v286_v11 = vsel %vm285_vm0, 1, %v1105_v0  ;;  %v318_v13 = vsel %vm317_vm1, 1, %v1105_v0  ;;  %s751_s29 = scalar_lea.sflag [#allocation4], %s1256_s26  ;;  %p1621_p11 = scmp.ne.s32.totalorder %s1597_s9, 0 }
  0x3c   : > { %940 = vrot.lane.b32.xlu1 %v939_v3, %s1106_s16  ;;  %930 = vrot.lane.b32.xlu0 %v939_v3, %s1107_s18  ;;  %vm337_vm2 = vcmp.lt.s32.totalorder %v1291_v12, 1  ;;  %vm305_vm3 = vcmp.lt.s32.totalorder %v1291_v12, 16  ;;  %vm1589_vm4 = vcmp.lt.s32.totalorder %v1291_v12, 17  ;;  %vm283_vm5 = vcmp.ge.s32.totalorder %v1291_v12, 16 }
  0x3d   : > { %v1293_v14 = vrot.slane %v286_v11, %v289_v9  ;;  %v1295_v15 = vrot.slane %v286_v11, %v293_v10  ;;  %v1297_v16 = vrot.slane %v318_v13, %v289_v9  ;;  %v1303_v19 = vrot.slane %v318_v13, %v293_v10 }
  0x3e   : > { %v1306_v20 = vadd.s32 128, %v1291_v12  ;;  %vm1590_vm9 = vcmp.lt.s32.totalorder %v1291_v12, 127  ;;  %vm314_vm10 = vcmp.lt.s32.totalorder %v1291_v12, 15  ;;  %vm1591_vm15 = vcmp.lt.s32.totalorder %v1291_v12, 112 }
  0x3f   : > { %vm296_vm6 = vcmp.eq.s32.totalorder %v1295_v15, 1  ;;  %vm295_vm7 = vcmp.eq.s32.totalorder %v1293_v14, 1  ;;  %vm327_vm8 = vcmp.eq.s32.totalorder %v1297_v16, 1  ;;  %vm328_vm13 = vcmp.eq.s32.totalorder %v1303_v19, 1 }
  0x40   : > { %945 = vrot.lane.b32.xlu1 %v939_v3, %s1108_s8  ;;  %935 = vrot.lane.b32.xlu0 %v939_v3, %s1109_s20  ;;  %vm1325_vm12 = vmand %vm283_vm5, %vm295_vm7  ;;  %vm359_vm14 = vcmp.lt.s32.totalorder %v1306_v20, 240  ;;  %vm1592_vm0 = vcmp.lt.s32.totalorder %v1291_v12, 113 }
  0x41   : > { %vm1339_vm1 = vmand %vm283_vm5, %vm327_vm8 }
  0x44   : > { %950 = vrot.lane.b32.xlu0 %v939_v3, %s1110_s7  ;;  %955 = vrot.lane.b32.xlu1 %v939_v3, %s1111_s12 }
  0x48   : > { %960 = vrot.lane.b32.xlu0 %v939_v3, %s1112_s13  ;;  %373 = vrot.lane.b32.xlu1 %v1266_v1, %s1113_s11 }
  0x4c   : > { %375 = vrot.lane.b32.xlu0 %v1270_v2, %s1113_s11  ;;  %421 = vperm.xlu1 %964, %v418_v5  }
  0xae   : > { %v941_v17 = vpop.permute.xlu1 %940  ;;  %v931_v18 = vpop.permute.xlu0 %930 }
  0xaf   : > { %v943_v21 = vunpack.i.h.bf16 %v941_v17  ;;  %v942_v22 = vunpack.i.l.bf16 %v941_v17  ;;  %v933_v23 = vunpack.i.h.bf16 %v931_v18  ;;  %v932_v24 = vunpack.i.l.bf16 %v931_v18 }
  0xb1   : > { %v338_v25 = vsel %vm337_vm2, %v932_v24, %v933_v23  ;;  %v339_v26 = vsel %vm337_vm2, %v933_v23, %v932_v24  ;;  %v281_v27 = vsel %vm1589_vm4, %v942_v22, %v943_v21  ;;  %v282_v28 = vsel %vm1589_vm4, %v943_v21, %v942_v22 }
  0xb2   : > { %v946_v30 = vpop.permute.xlu1 %945  ;;  %v936_v31 = vpop.permute.xlu0 %935  ;;  %v341_v32 = vsel %vm296_vm6, %v338_v25, 0.0  ;;  %v300_v38 = vsel %vm296_vm6, %v281_v27, 0.0  ;;  %v299_v40 = vsel %vm1325_vm12, %v282_v28, 0.0  ;;  %v340_v41 = vsel %vm295_vm7, %v339_v26, 0.0 }
  0xb3   : > { %v948_v33 = vunpack.i.h.bf16 %v946_v30  ;;  %v947_v34 = vunpack.i.l.bf16 %v946_v30  ;;  %v938_v35 = vunpack.i.h.bf16 %v936_v31  ;;  %v937_v36 = vunpack.i.l.bf16 %v936_v31 }
  0xb4   : > { %v393_v39 = vrot.slane %v341_v32, 4  ;;  %vm1594_vm4 = vcmp.lt.s32.totalorder %v1291_v12, 111  ;;  %v392_v59 = vrot.slane %v340_v41, 4  ;;  %v417_v41 = vld [vmem:[%s1583_s2] sm:$0xf] }
  0xb5   : > { %v307_v42 = vsel %vm305_vm3, %v938_v35, %v937_v36  ;;  %v306_v43 = vsel %vm305_vm3, %v937_v36, %v938_v35  ;;  %v315_v44 = vsel %vm314_vm10, %v947_v34, %v948_v33  ;;  %v316_v45 = vsel %vm314_vm10, %v948_v33, %v947_v34 }
  0xb6   : > { %v951_v46 = vpop.permute.xlu0 %950  ;;  %v956_v47 = vpop.permute.xlu1 %955  ;;  %v332_v48 = vsel %vm328_vm13, %v315_v44, 0.0  ;;  %v387_v49 = vrot.slane %v306_v43, 4  ;;  %v308_v50 = vsel %vm283_vm5, %v307_v42, 0.0  ;;  %v331_v51 = vsel %vm1339_vm1, %v316_v45, 0.0 }
  0xb7   : > { %v953_v52 = vunpack.i.h.bf16 %v951_v46  ;;  %v952_v53 = vunpack.i.l.bf16 %v951_v46  ;;  %v958_v54 = vunpack.i.h.bf16 %v956_v47  ;;  %v957_v55 = vunpack.i.l.bf16 %v956_v47 }
  0xb8   : > { %v410_v56 = vsel %vm408_vm11, %v300_v38, %v387_v49  ;;  %v412_v57 = vsel %vm408_vm11, %v332_v48, %v393_v39  ;;  %v386_v58 = vrot.slane %v308_v50, 4  ;;  %v411_v6 = vsel %vm408_vm11, %v331_v51, %v392_v59 }
  0xb9   : > { %v347_v60 = vsel %vm1590_vm9, %v952_v53, %v953_v52  ;;  %v348_v61 = vsel %vm1590_vm9, %v953_v52, %v952_v53  ;;  %v369_v62 = vsel %vm1591_vm15, %v957_v55, %v958_v54  ;;  %v370_v63 = vsel %vm1591_vm15, %v958_v54, %v957_v55  ;;  %vm1386_vm9 = vmand %vm359_vm14, %vm296_vm6 }
  0xba   : > { %v349_v0 = vsel %vm327_vm8, %v347_v60, 0.0  ;;  %v350_v3 = vsel %vm328_vm13, %v348_v61, 0.0  ;;  %v372_v4 = vsel %vm359_vm14, %v370_v63, 0.0  ;;  %v961_v5 = vpop.permute.xlu0 %960  ;;  %v404_v9 = vrot.slane %v369_v62, 4  ;;  %v374_v22 = vpop.permute.xlu1 %373  ;;  %vm1400_vm15 = vmand %vm359_vm14, %vm328_vm13 }
  0xbb   : > { %v398_v7 = vrot.slane %v349_v0, 4  ;;  %v399_v8 = vrot.slane %v350_v3, 4  ;;  %v963_v10 = vunpack.i.h.bf16 %v961_v5  ;;  %v405_v11 = vrot.slane %v372_v4, 4 }
  0xbc   : > { %v962_v13 = vunpack.i.l.bf16 %v961_v5  ;;  %v857_v17 = vpack.c.bf16 %v412_v57, %v410_v56  ;;  %v409_v18 = vsel %vm408_vm11, %v299_v40, %v386_v58 }
  0xbd   : > { %v859_v23 = vpack.c.bf16 %v411_v6, %v409_v18  ;;  %v414_v32 = vsel %vm408_vm11, %v1270_v2, %v399_v8  ;;  %v413_v34 = vsel %vm408_vm11, %v1266_v1, %v398_v7 }
  0xbe   : > { %v356_v24 = vsel %vm1592_vm0, %v962_v13, %v963_v10  ;;  %v357_v25 = vsel %vm1592_vm0, %v963_v10, %v962_v13  ;;  %858 = vmatprep.subr.bf16.mxu0 %v857_v17  ;;  %v376_v26 = vpop.permute.xlu0 %375  ;;  %vm1593_vm0 = vcmask 293888   ;;  %v630_v10 = vld [vmem:[%s1586_s5] sm:$0xf] }
  0xbf   : > { %860 = vmatpush1.bf16.msra.mxu0 %v859_v23  ;;  %v363_v27 = vsel %vm1386_vm9, %v357_v25, 0.0  ;;  %v379_v30 = vsel %vm1594_vm4, %v376_v26, %v374_v22  ;;  %v362_v31 = vsel %vm295_vm7, %v356_v24, 0.0  ;;  %v378_v39 = vsel %vm1594_vm4, %v374_v22, %v376_v26 }
  0xc0   : > { %v416_v33 = vsel %vm408_vm11, %v363_v27, %v405_v11  ;;  %v415_v35 = vsel %vm408_vm11, %v362_v31, %v404_v9  ;;  %v383_v40 = vsel %vm1400_vm15, %v379_v30, 0.0  ;;  %v382_v2 = vsel %vm327_vm8, %v378_v39, 0.0 }
  0xc1   : > { %v861_v36 = vpack.c.bf16 %v416_v33, %v414_v32  ;;  %v863_v38 = vpack.c.bf16 %v415_v35, %v413_v34 }
  0xc3   : > { %862 = vmatprep.subr.bf16.mxu0 %v861_v36 }
  0xc4   : > { %864 = vmatpush1.bf16.msra.mxu0 %v863_v38 }
  0xc5   : > { %844 = vmatprep.subr.msk.mxu0 %vm408_vm11, %v383_v40 }
  0xc8   : > { %845 = vmatpush1.msk.msra.mxu0 %vm408_vm11, %v382_v2 }
  0xc9   : > { %846 = vmatmul.mubr.msk.f32.vlgmr.msra.gmra.mrb[0].mxu0 %vm1593_vm0, %v417_v41 }
  0xcb   : > { %v422_v42 = vpop.permute.xlu1 %421 }
 0x19c   : > { %v500_v43 = vpop.f32.mrb[0].mxu0 }
 0x19d   : > { %v501_v44 = vadd.f32 %v500_v43, %v422_v42  ;;  %v502_v45 = vpop.f32.mrb[1].mxu0 }
 0x19e   : > { %v503_v46 = vadd.f32 %v502_v45, %v422_v42 }
 0x19f   : > { %v505_v47 = vsel %vm408_vm11, %v501_v44, 0.0  ;;  %v511_v48 = vmul.f32 %v501_v44, %v501_v44 }
 0x1a0   : > { %v506_v49 = vsel %vm408_vm11, %v503_v46, 0.0  ;;  %v512_v50 = vmul.f32 %v503_v46, %v503_v46 }
 0x1a1   : > { %v507_v51 = vadd.f32 %v506_v49, %v505_v47  ;;  %v513_v52 = vsel %vm408_vm11, %v511_v48, 0.0 }
 0x1a2   : > { %v514_v53 = vsel %vm408_vm11, %v512_v50, 0.0 }
 0x1a3   : > { %508 = vadd.xlane.f32.xlu0 %v507_v51  ;;  %v515_v54 = vadd.f32 %v514_v53, %v513_v52 }
 0x1a5   : > { %516 = vadd.xlane.f32.xlu1 %v515_v54 }
 0x230   : > { %v509_v55 = vpop.xlane.xlu0 %508 }
 0x231   : > { %v510_v56 = vmul.f32 0.00390625, %v509_v55 }
 0x232   : > { %v517_v57 = vpop.xlane.xlu1 %516 }
 0x233   : > { %v518_v58 = vmul.f32 0.00390625, %v517_v57  ;;  %v519_v59 = vmul.f32 %v510_v56, %v510_v56  ;;  %v521_v62 = vsub.f32 %v501_v44, %v510_v56  ;;  %v522_v63 = vsub.f32 %v503_v46, %v510_v56 }
 0x235   : > { %v520_v60 = vsub.f32 %v518_v58, %v519_v59 }
 0x237   : > { %v523_v61 = vadd.f32 1e-05, %v520_v60 }
 0x239   : > { %1002 = vrsqrt.f32 %v523_v61 }
 0x243   : > { %v1003_v0 = vpop.eup %1002 }
 0x244   : > { %v525_v3 = vmul.f32 %v1003_v0, %v521_v62  ;;  %v526_v4 = vmul.f32 %v1003_v0, %v522_v63 }
 0x246   : > { %vm527_vm0 = vcmp.ge.f32.partialorder %v525_v3, 0.0  ;;  %vm528_vm4 = vcmp.ge.f32.partialorder %v526_v4, 0.0  ;;  %v529_v5 = vmul.f32 0.2, %v525_v3  ;;  %v530_v6 = vmul.f32 0.2, %v526_v4 }
 0x248   : > { %v1430_v7 = vsel %vm527_vm0, %v525_v3, %v529_v5  ;;  %v1432_v8 = vsel %vm528_vm4, %v526_v4, %v530_v6  ;;  %vm1612_vm4 = vcmp.lt.s32.totalorder %v1291_v12, 112 }
 0x249   : > { %v970_v9 = vpack.i.bf16 %v1432_v8, %v1430_v7 }
 0x24b   : > { %971 = vrot.lane.b32.xlu1 %v970_v9, %s1109_s20  ;;  %966 = vrot.lane.b32.xlu0 %v970_v9, %s1107_s18  ;;  %s267_s20 = scalar_lea.vmem [#allocation5], %s842_s28 }
 0x24f   : > { %981 = vrot.lane.b32.xlu1 %v970_v9, %s1108_s8  ;;  %976 = vrot.lane.b32.xlu0 %v970_v9, %s1106_s16  ;;  %s856_s8 = sshll.u32 %s1172_s25, 7  ;;  %s1115_s25 = smov [#allocation5]  }
 0x250   : > { %s1040_s28 = sshll.u32 %s1115_s25, 4  ;;  %s1041_s28 = int_to_ptr.vmem [resolvable:$false] %s1040_s28 }
 0x251   : > { %s1042_s14 = scalar_lea.vmem %s1041_s28, 256 }
 0x253   : > { %991 = vrot.lane.b32.xlu1 %v970_v9, %s1111_s12  ;;  %986 = vrot.lane.b32.xlu0 %v970_v9, %s1110_s7  ;;  %s765_s7 = sshll.u32 %s267_s20, 4  ;;  %s1539_s7 = int_to_ptr.vmem [resolvable:$true] %s765_s7 }
 0x254   : > { %s1036_s19 = scalar_lea.vmem %s1539_s7, 128  ;;  %p1043_p7 = scmp.lt.s32.totalorder %s1539_s7, %s1041_s28 }
 0x255   : > { %p1037_p6 = scmp.ne.s32.totalorder %s1539_s7, %s1036_s19  ;;  %p1044_p10 = scmp.lt.s32.totalorder %s1042_s14, %s1036_s19 }
 0x257   : > { %589 = vrot.lane.b32.xlu1 %v1430_v7, %s1113_s11  ;;  %996 = vrot.lane.b32.xlu0 %v970_v9, %s1112_s13  ;;  %p1038_p12 = pnand %p1037_p6, %p1621_p11  ;;  %p1045_p2 = por %p1044_p10, %p1043_p7 }
 0x259   : > { %p1039_p13 = pneg %p1038_p12 }
 0x25b   : > { %633 = vperm.xlu1 %964, %v630_v10   ;;  %591 = vrot.lane.b32.xlu0 %v1432_v8, %s1113_s11  ;;  %s1537_s11 = scalar_lea.hbm %s1587_s6, %s856_s8  ;;  %p1046_p4 = pnand %p1045_p2, %p1039_p13 }
 0x2bd   : > { %v972_v11 = vpop.permute.xlu1 %971  ;;  %v967_v13 = vpop.permute.xlu0 %966 }
 0x2be   : > { %v974_v17 = vunpack.i.h.bf16 %v972_v11  ;;  %v973_v18 = vunpack.i.l.bf16 %v972_v11  ;;  %v969_v22 = vunpack.i.h.bf16 %v967_v13  ;;  %v968_v23 = vunpack.i.l.bf16 %v967_v13 }
 0x2c0   : > { %v546_v24 = vsel %vm305_vm3, %v974_v17, %v973_v18  ;;  %v561_v25 = vsel %vm337_vm2, %v968_v23, %v969_v22  ;;  %v562_v26 = vsel %vm337_vm2, %v969_v22, %v968_v23  ;;  %v545_v27 = vsel %vm305_vm3, %v973_v18, %v974_v17 }
 0x2c1   : > { %v982_v30 = vpop.permute.xlu1 %981  ;;  %v977_v31 = vpop.permute.xlu0 %976  ;;  %v564_v32 = vsel %vm296_vm6, %v561_v25, 0.0  ;;  %v547_v33 = vsel %vm283_vm5, %v546_v24, 0.0  ;;  %v563_v34 = vsel %vm295_vm7, %v562_v26, 0.0  ;;  %v600_v40 = vrot.slane %v545_v27, 4 }
 0x2c2   : > { %v984_v35 = vunpack.i.h.bf16 %v982_v30  ;;  %v983_v36 = vunpack.i.l.bf16 %v982_v30  ;;  %v979_v38 = vunpack.i.h.bf16 %v977_v31  ;;  %v978_v39 = vunpack.i.l.bf16 %v977_v31 }
 0x2c3   : > { %v606_v2 = vrot.slane %v564_v32, 4  ;;  %v599_v41 = vrot.slane %v547_v33, 4  ;;  %v605_v42 = vrot.slane %v563_v34, 4  ;;  %vm1610_vm2 = vcmp.lt.s32.totalorder %v1291_v12, 17 }
 0x2c4   : > { %v537_v43 = vsel %vm1610_vm2, %v978_v39, %v979_v38  ;;  %v553_v44 = vsel %vm314_vm10, %v983_v36, %v984_v35  ;;  %vm1611_vm3 = vmmov %vm1610_vm2  ;;  %v554_v46 = vsel %vm314_vm10, %v984_v35, %v983_v36  ;;  %vm1613_vm5 = vcmp.lt.s32.totalorder %v1291_v12, 127 }
 0x2c5   : > { %v538_v45 = vsel %vm1611_vm3, %v979_v38, %v978_v39  ;;  %v992_v47 = vpop.permute.xlu1 %991  ;;  %v987_v48 = vpop.permute.xlu0 %986  ;;  %v540_v49 = vsel %vm296_vm6, %v537_v43, 0.0  ;;  %v556_v50 = vsel %vm328_vm13, %v553_v44, 0.0  ;;  %v555_v52 = vsel %vm1339_vm1, %v554_v46, 0.0  ;;  %vm1614_vm6 = vmmov %vm1613_vm5 }
 0x2c6   : > { %v539_v51 = vsel %vm1325_vm12, %v538_v45, 0.0  ;;  %v994_v53 = vunpack.i.h.bf16 %v992_v47  ;;  %v993_v54 = vunpack.i.l.bf16 %v992_v47  ;;  %v989_v55 = vunpack.i.h.bf16 %v987_v48  ;;  %vm1615_vm10 = vmmov %vm1612_vm4 }
 0x2c7   : > { %v988_v56 = vunpack.i.l.bf16 %v987_v48  ;;  %v622_v57 = vsel %vm408_vm11, %v540_v49, %v600_v40  ;;  %v624_v58 = vsel %vm408_vm11, %v556_v50, %v606_v2  ;;  %v621_v15 = vsel %vm408_vm11, %v539_v51, %v599_v41 }
 0x2c8   : > { %v586_v59 = vsel %vm1612_vm4, %v994_v53, %v993_v54  ;;  %v623_v60 = vsel %vm408_vm11, %v555_v52, %v605_v42  ;;  %v585_v0 = vsel %vm1615_vm10, %v993_v54, %v994_v53  ;;  %v865_v10 = vpack.c.bf16 %v624_v58, %v622_v57 }
 0x2c9   : > { %v569_v29 = vsel %vm1613_vm5, %v988_v56, %v989_v55  ;;  %v570_v37 = vsel %vm1614_vm6, %v989_v55, %v988_v56  ;;  %v997_v63 = vpop.permute.xlu0 %996  ;;  %v588_v3 = vsel %vm359_vm14, %v586_v59, 0.0  ;;  %v867_v11 = vpack.c.bf16 %v623_v60, %v621_v15  ;;  %v590_v24 = vpop.permute.xlu1 %589 }
 0x2ca   : > { %v571_v61 = vsel %vm327_vm8, %v569_v29, 0.0  ;;  %v572_v62 = vsel %vm328_vm13, %v570_v37, 0.0  ;;  %v999_v5 = vunpack.i.h.bf16 %v997_v63  ;;  %v998_v9 = vunpack.i.l.bf16 %v997_v63  ;;  %866 = vmatprep.subr.bf16.mxu1 %v865_v10 }
 0x2cb   : > { %v611_v4 = vrot.slane %v571_v61, 4  ;;  %v612_v6 = vrot.slane %v572_v62, 4  ;;  %v617_v13 = vrot.slane %v585_v0, 4  ;;  %v618_v17 = vrot.slane %v588_v3, 4  ;;  %868 = vmatpush1.bf16.msra.mxu1 %v867_v11 }
 0x2cc   : > { %vm1616_vm12 = vcmp.lt.s32.totalorder %v1291_v12, 113  ;;  %vm1618_vm14 = vcmp.lt.s32.totalorder %v1291_v12, 111 }
 0x2cd   : > { %v577_v18 = vsel %vm1616_vm12, %v998_v9, %v999_v5  ;;  %vm1617_vm13 = vmmov %vm1616_vm12  ;;  %v592_v22 = vpop.permute.xlu0 %591  ;;  %v626_v25 = vsel %vm408_vm11, %v1432_v8, %v612_v6  ;;  %v625_v27 = vsel %vm408_vm11, %v1430_v7, %v611_v4  ;;  %v629_v7 = vld [vmem:[%s1585_s4] sm:$0xf] }
 0x2ce   : > { %v578_v19 = vsel %vm1617_vm13, %v999_v5, %v998_v9  ;;  %v579_v23 = vsel %vm295_vm7, %v577_v18, 0.0  ;;  %v594_v31 = vsel %vm1618_vm14, %v592_v22, %v590_v24  ;;  %vm1620_vm7 = vcmask 293888  }
 0x2cf   : > { %v580_v20 = vsel %vm1386_vm9, %v578_v19, 0.0  ;;  %v627_v30 = vsel %vm408_vm11, %v579_v23, %v617_v13  ;;  %vm1619_vm9 = vmmov %vm1618_vm14  ;;  %v596_v33 = vsel %vm1400_vm15, %v594_v31, 0.0 }
 0x2d0   : > { %v628_v26 = vsel %vm408_vm11, %v580_v20, %v618_v17  ;;  %v871_v21 = vpack.c.bf16 %v627_v30, %v625_v27  ;;  %v593_v14 = vsel %vm1619_vm9, %v590_v24, %v592_v22 }
 0x2d1   : > { %v869_v32 = vpack.c.bf16 %v628_v26, %v626_v25  ;;  %v595_v8 = vsel %vm327_vm8, %v593_v14, 0.0 }
 0x2d3   : > { %870 = vmatprep.subr.bf16.mxu1 %v869_v32 }
 0x2d4   : > { %872 = vmatpush1.bf16.msra.mxu1 %v871_v21 }
 0x2d5   : > { %847 = vmatprep.subr.msk.mxu1 %vm408_vm11, %v596_v33 }
 0x2d8   : > { %848 = vmatpush1.msk.msra.mxu1 %vm408_vm11, %v595_v8 }
 0x2d9   : > { %849 = vmatmul.mubr.msk.f32.vlgmr.msra.gmra.mrb[0].mxu1 %vm1620_vm7, %v629_v7 }
 0x2da   : > { %v634_v34 = vpop.permute.xlu1 %633 }
 0x3ac   : > { %v711_v12 = vpop.f32.mrb[0].mxu1 }
 0x3ad   : > { %v712_v35 = vadd.f32 %v711_v12, %v634_v34  ;;  %v713_v36 = vpop.f32.mrb[1].mxu1 }
 0x3ae   : > { %v714_v28 = vadd.f32 %v713_v36, %v634_v34 }
 0x3af   : > { %v716_v38 = vsel %vm408_vm11, %v712_v35, 0.0  ;;  %v722_v39 = vmul.f32 %v712_v35, %v712_v35 }
 0x3b0   : > { %v717_v40 = vsel %vm408_vm11, %v714_v28, 0.0  ;;  %v723_v2 = vmul.f32 %v714_v28, %v714_v28 }
 0x3b1   : > { %v718_v41 = vadd.f32 %v717_v40, %v716_v38  ;;  %v724_v42 = vsel %vm408_vm11, %v722_v39, 0.0 }
 0x3b2   : > { %v725_v16 = vsel %vm408_vm11, %v723_v2, 0.0 }
 0x3b3   : > { %719 = vadd.xlane.f32.xlu0 %v718_v41  ;;  %v726_v43 = vadd.f32 %v725_v16, %v724_v42 }
 0x3b5   : > { %727 = vadd.xlane.f32.xlu1 %v726_v43 }
 0x440   : > { %v720_v44 = vpop.xlane.xlu0 %719 }
 0x441   : > { %v721_v45 = vmul.f32 0.00390625, %v720_v44 }
 0x442   : > { %v728_v46 = vpop.xlane.xlu1 %727 }
 0x443   : > { %v729_v47 = vmul.f32 0.00390625, %v728_v46  ;;  %v730_v48 = vmul.f32 %v721_v45, %v721_v45  ;;  %v732_v51 = vsub.f32 %v712_v35, %v721_v45  ;;  %v733_v52 = vsub.f32 %v714_v28, %v721_v45 }
 0x445   : > { %v731_v49 = vsub.f32 %v729_v47, %v730_v48 }
 0x447   : > { %v734_v50 = vadd.f32 1e-05, %v731_v49 }
 0x449   : > { %1004 = vrsqrt.f32 %v734_v50 }
 0x453   : > { %v1005_v53 = vpop.eup %1004 }
 0x454   : > { %v736_v54 = vmul.f32 %v1005_v53, %v732_v51  ;;  %v737_v55 = vmul.f32 %v1005_v53, %v733_v52 }
 0x456   : > { %vm738_vm8 = vcmp.ge.f32.partialorder %v736_v54, 0.0  ;;  %vm739_vm11 = vcmp.ge.f32.partialorder %v737_v55, 0.0  ;;  %v740_v56 = vmul.f32 0.2, %v736_v54  ;;  %v741_v57 = vmul.f32 0.2, %v737_v55 }
 0x458   : > { %v742_v58 = vsel %vm738_vm8, %v736_v54, %v740_v56  ;;  %v743_v15 = vsel %vm739_vm11, %v737_v55, %v741_v57 }
 0x459   : > { %v746_v59 = vcombine.low %v742_v58, %v743_v15 }
 0x45b   : > { %v748_v29 = vadd.f32 %v746_v59, %v1266_v1 }
 0x45d   : > { %749 = vst [vmem:[%s267_s20] sm:$0xff] %v748_v29 }
 0x45e   : > { %1049 = shalt.err (!%p1046_p4)
}
 0x45f   : > { %s1050_s26 = scalar_lea.hbm %s1537_s11, 128  ;;  %s1054_s16 = scalar_lea.hbm %s1587_s6, 256 }
 0x460   : > { %p1051_p5 = scmp.ne.s32.totalorder %s1537_s11, %s1050_s26  ;;  %p1055_p0 = scmp.lt.u32.totalorder %s1537_s11, %s1587_s6 }
 0x461   : > { %p1056_p1 = scmp.lt.u32.totalorder %s1054_s16, %s1050_s26  ;;  %p1058_p6 = scmp.lt.u32.totalorder %s1050_s26, %s1537_s11 }
 0x462   : > { %p1052_p8 = pnand %p1051_p5, %p1621_p11 }
 0x463   : > { %p1057_p3 = por %p1056_p1, %p1055_p0 }
 0x464   : > { %p1053_p9 = pneg %p1052_p8 }
 0x465   : > { %p1059_p12 = por %p1058_p6, %p1057_p3 }
 0x467   : > { %p1060_p13 = pnand %p1059_p12, %p1053_p9 }
 0x469   : > { %1063 = shalt.err (!%p1060_p13)
}
 0x46a   : > { %875 = dma.vmem_to_hbm [thread:$0]  (%p1621_p11), %s1539_s7, 128, %s1537_s11, %s751_s29  }
 0x46b PF: > { %s777_s20 = sand.u32 1, %s1090_s21   ;;  %p1622_p7 = scmp.ne.s32.totalorder %s1598_s10, 0 }
 0x46c   : > { %p1623_p10 = scmp.ge.s32.totalorder %s1102_s24, 2  ;;  %s778_s12 = scalar_lea.sflag [#allocation4], %s777_s20 }
 0x46e   : > { %p882_p2 = pnand %p1623_p10, %p1622_p7 }
 0x470   : > { %1085 = dma.done.wait (!%p882_p2), %s778_s12, 128  }
 0x471   : > { %1087 = vsyncadd (!%p882_p2), %s778_s12, 4294967168  ;;  %p19_p4 = scmp.ge.s32.totalorder %s1176_s27, 4   ;;  %s1624_s21 = smov %s1094_s22 }
 0x472   : > { %s1625_s22 = smov %s1098_s23  ;;  %s1626_s23 = smov %s1188_s30 }
 0x473   : > { %s1627_s24 = smov %s1176_s27  ;;  %21 = sbr.rel (!%p19_p4) target bundleno = 5 (0x5), region = 89 }
 0x47a   :  { %783 = vsyncpa [#allocation3], 1 }
 0x47b   :  { %785 = vsyncpa [#allocation3 + $0x1], 1 }
 0x47c   :  { %786 = vsyncpa [#allocation4], 1 }
 0x47d   :  { %788 = vsyncpa [#allocation4 + $0x1], 1 }

</bundles_post_ra>
